<compile_context>
chip_gen: v6e
topology: v6e:2x2x1
jax: 0.10.0
libtpu: 0.0.40
codegen_flags: <defaults>
</compile_context>

<pallas_src>
import functools

import jax
import jax.numpy as jnp
from jax import lax
from jax.experimental import pallas as pl
from jax.experimental.pallas import tpu as pltpu


def _round_up(x: int, m: int) -> int:
    return ((x + m - 1) // m) * m


def _make_lstm_kernel(T: int, TB: int, H: int):
    """Layer-0 LSTM recurrence + linear head for one batch tile of TB rows.

    Ref layout (all VMEM, 2-D):
      x_ref     : (T*TB, F)   time-major rows for this batch tile (row = t*TB + b)
      w_ih_ref  : (F, 4H)     float32 input->gate weights
      w_hh_ref  : (H, 4H)     recurrent weights (float32 or bfloat16)
      b_ref     : (1, 4H)     b_ih + b_hh, float32
      w_lin_ref : (1, H)      linear head weight row, float32
      b_lin_ref : (1, 1)      linear head bias, float32
      out_ref   : (TB, 1)     predictions for this batch tile, float32
      xw_ref    : (T*TB, 4H)  scratch: hoisted input projection, float32
    """
    G = 4 * H

    def kernel(x_ref, w_ih_ref, w_hh_ref, b_ref, w_lin_ref, b_lin_ref,
               out_ref, xw_ref):
        # ---- Hoisted input projection: one big MXU matmul, off the serial path.
        xw_ref[...] = (jnp.dot(x_ref[...], w_ih_ref[...],
                               preferred_element_type=jnp.float32)
                       + b_ref[...])                       # (T*TB, 4H) f32

        w_hh = w_hh_ref[...]                               # hoist weight load

        def body(t, carry):
            h, c = carry                                   # (TB, H) f32
            row = pl.multiple_of(t * TB, TB)               # sublane-aligned start
            gates = (xw_ref[pl.ds(row, TB), :]
                     + jnp.dot(h.astype(w_hh.dtype), w_hh,
                               preferred_element_type=jnp.float32))   # (TB, 4H)
            # Full-width activations over the whole gates vreg, then slice.
            # Gate order matches PyTorch: i, f, g, o.
            sg = jax.nn.sigmoid(gates)
            th = jnp.tanh(gates)
            i_g = sg[:, 0:H]
            f_g = sg[:, H:2 * H]
            g_g = th[:, 2 * H:3 * H]
            o_g = sg[:, 3 * H:G]
            c_new = f_g * c + i_g * g_g
            h_new = o_g * jnp.tanh(c_new)
            return h_new, c_new

        init = (jnp.zeros((TB, H), jnp.float32),
                jnp.zeros((TB, H), jnp.float32))
        # T is static and small: fully unroll the recurrence.
        h_fin, _ = lax.fori_loop(0, T, body, init, unroll=True)

        # ---- Linear head on hn[0]: VPU multiply + lane reduction (no MXU pass).
        out_ref[...] = (jnp.sum(h_fin * w_lin_ref[...], axis=-1, keepdims=True)
                        + b_lin_ref[...])

    return kernel


def shallow_regression_lstm(x, layer_params, w_lin, b_lin, *, hidden_units,
                            recurrent_dtype=jnp.float32, batch_tile=8):
    """Forward pass of ShallowRegressionLSTM.

    x            : (B, T, F) float32, batch-first (PyTorch convention)
    layer_params : list of (w_ih (F_l, 4H), w_hh (H, 4H), b (1, 4H)) per layer.
                   Only layer 0 is computed: the module feeds hn[0] to the head,
                   so layers >= 1 cannot affect the output (bit-identical).
    w_lin        : (H, 1) float32, b_lin : (1, 1) float32
    recurrent_dtype : dtype for the recurrent weight matmul (bf16 on v6e/v7x for
                   the fast MXU path; accumulation stays float32).
    returns      : (B,) float32  (== linear(hn[0]).flatten())
    """
    B, T, F = x.shape
    H = hidden_units
    G = 4 * H
    assert batch_tile % 8 == 0, "batch tile must be a sublane multiple"

    # Only layer 0 matters for the output (hn[0] head).
    w_ih, w_hh, b = layer_params[0]

    TB = batch_tile
    B_pad = _round_up(B, TB)          # pad batch to full sublane tiles (MXU rows)
    nb = B_pad // TB

    # Reorder x so each grid step's block is already the 2-D LHS of the hoisted
    # input projection: rows ordered (batch_tile, t, b_within_tile).
    x_pad = jnp.pad(x, ((0, B_pad - B), (0, 0), (0, 0)))
    x_blk = jnp.reshape(
        jnp.transpose(jnp.reshape(x_pad, (nb, TB, T, F)), (0, 2, 1, 3)),
        (nb * T * TB, F))

    w_ih = w_ih.astype(jnp.float32)            # off-critical-path, tiny K: keep f32
    w_hh_c = w_hh.astype(recurrent_dtype)      # critical-path recurrent weights
    b = b.astype(jnp.float32)
    w_lin_row = jnp.reshape(w_lin, (1, H)).astype(jnp.float32)
    b_lin_2d = jnp.reshape(b_lin, (1, 1)).astype(jnp.float32)

    kernel = _make_lstm_kernel(T, TB, H)

    out = pl.pallas_call(
        kernel,
        out_shape=jax.ShapeDtypeStruct((B_pad, 1), jnp.float32),
        grid=(nb,),
        in_specs=[
            pl.BlockSpec((T * TB, F), lambda i: (i, 0)),   # batch tile of x
            pl.BlockSpec((F, G), lambda i: (0, 0)),        # W_ih (resident)
            pl.BlockSpec((H, G), lambda i: (0, 0)),        # W_hh (resident)
            pl.BlockSpec((1, G), lambda i: (0, 0)),        # bias
            pl.BlockSpec((1, H), lambda i: (0, 0)),        # linear weight row
            pl.BlockSpec((1, 1), lambda i: (0, 0)),        # linear bias
        ],
        out_specs=pl.BlockSpec((TB, 1), lambda i: (i, 0)),
        scratch_shapes=[pltpu.VMEM((T * TB, G), jnp.float32)],  # hoisted x @ W_ih
        compiler_params=pltpu.CompilerParams(
            dimension_semantics=("parallel",)),            # megacore-shardable
    )(x_blk, w_ih, w_hh_c, b, w_lin_row, b_lin_2d)

    return out[:B, 0]                                      # == .flatten() -> (B,)


def _reference_forward(x, layer_params, w_lin, b_lin, *, hidden_units):
    """Pure-JAX reference (only layer 0 matters for the output, like hn[0])."""
    B, T, F = x.shape
    H = hidden_units
    w_ih, w_hh, b = layer_params[0]

    def step(carry, xt):
        h, c = carry
        gates = xt @ w_ih + h @ w_hh + b
        i_g = jax.nn.sigmoid(gates[:, :H])
        f_g = jax.nn.sigmoid(gates[:, H:2 * H])
        g_g = jnp.tanh(gates[:, 2 * H:3 * H])
        o_g = jax.nn.sigmoid(gates[:, 3 * H:])
        c = f_g * c + i_g * g_g
        h = o_g * jnp.tanh(c)
        return (h, c), None

    init = (jnp.zeros((B, H), jnp.float32), jnp.zeros((B, H), jnp.float32))
    (h_fin, _), _ = lax.scan(step, init, jnp.transpose(x, (1, 0, 2)))
    return (h_fin @ w_lin + b_lin).reshape(-1)


if __name__ == "__main__":
    # Shapes consistent with the module's forward: x is (batch, seq_len, num_sensors).
    batch = 2
    seq_len = 8
    num_sensors = 4
    hidden_units = 32
    num_layers = 2

    key = jax.random.PRNGKey(0)
    k_x, k_p = jax.random.split(key)

    x = jax.random.normal(k_x, (batch, seq_len, num_sensors), dtype=jnp.float32)

    # Parameter init mimicking PyTorch's U(-1/sqrt(H), 1/sqrt(H)).
    bound = 1.0 / (hidden_units ** 0.5)
    layer_params = []
    for l in range(num_layers):
        in_feat = num_sensors if l == 0 else hidden_units
        k_p, k1, k2, k3, k4 = jax.random.split(k_p, 5)
        w_ih = jax.random.uniform(k1, (in_feat, 4 * hidden_units),
                                  minval=-bound, maxval=bound, dtype=jnp.float32)
        w_hh = jax.random.uniform(k2, (hidden_units, 4 * hidden_units),
                                  minval=-bound, maxval=bound, dtype=jnp.float32)
        b_ih = jax.random.uniform(k3, (1, 4 * hidden_units),
                                  minval=-bound, maxval=bound, dtype=jnp.float32)
        b_hh = jax.random.uniform(k4, (1, 4 * hidden_units),
                                  minval=-bound, maxval=bound, dtype=jnp.float32)
        layer_params.append((w_ih, w_hh, b_ih + b_hh))

    k_p, k5, k6 = jax.random.split(k_p, 3)
    w_lin = jax.random.uniform(k5, (hidden_units, 1),
                               minval=-bound, maxval=bound, dtype=jnp.float32)
    b_lin = jax.random.uniform(k6, (1, 1),
                               minval=-bound, maxval=bound, dtype=jnp.float32)

    fwd = functools.partial(shallow_regression_lstm, hidden_units=hidden_units)

    # Float32 path: must match the reference closely.
    out = jax.block_until_ready(fwd(x, layer_params, w_lin, b_lin))
    ref = jax.block_until_ready(
        _reference_forward(x, layer_params, w_lin, b_lin,
                           hidden_units=hidden_units))
    assert out.shape == (batch,), out.shape
    assert jnp.allclose(out, ref, atol=1e-4, rtol=1e-4), (out, ref)

    # bf16 recurrent-weight path (fast MXU path on v6e/v7x), f32 accumulation.
    out_bf16 = jax.block_until_ready(
        fwd(x, layer_params, w_lin, b_lin, recurrent_dtype=jnp.bfloat16))
    assert out_bf16.shape == (batch,), out_bf16.shape
    assert jnp.allclose(out_bf16, ref, atol=5e-2, rtol=5e-2), (out_bf16, ref)

    print("KERNEL_OK")
</pallas_src>

<mosaic_0001>
module attributes {stable_mosaic.version = 11 : i64} {
  func.func @kernel(%arg0: i32, %arg1: memref<64x4xf32, #tpu.memory_space<vmem>>, %arg2: memref<4x128xf32, #tpu.memory_space<vmem>>, %arg3: memref<32x128xf32, #tpu.memory_space<vmem>>, %arg4: memref<1x128xf32, #tpu.memory_space<vmem>>, %arg5: memref<1x32xf32, #tpu.memory_space<vmem>>, %arg6: memref<1x1xf32, #tpu.memory_space<vmem>>, %arg7: memref<8x1xf32, #tpu.memory_space<vmem>>, %arg8: memref<64x128xf32, #tpu.memory_space<vmem>>) attributes {dimension_semantics = [#tpu.dimension_semantics<parallel>], iteration_bounds = array<i64: 1>, scalar_prefetch = 0 : i64, scratch_operands = 1 : i64, tpu.core_type = #tpu.core_type<tc>, window_params = [{transform_indices = @transform_0, window_bounds = array<i64: 64, 4>}, {pipeline_mode = #tpu.pipeline_mode<synchronous>, transform_indices = @transform_1, window_bounds = array<i64: 4, 128>}, {pipeline_mode = #tpu.pipeline_mode<synchronous>, transform_indices = @transform_2, window_bounds = array<i64: 32, 128>}, {pipeline_mode = #tpu.pipeline_mode<synchronous>, transform_indices = @transform_3, window_bounds = array<i64: 1, 128>}, {pipeline_mode = #tpu.pipeline_mode<synchronous>, transform_indices = @transform_4, window_bounds = array<i64: 1, 32>}, {pipeline_mode = #tpu.pipeline_mode<synchronous>, transform_indices = @transform_5, window_bounds = array<i64: 1, 1>}, {transform_indices = @transform_6, window_bounds = array<i64: 8, 1>}]} {
    %c0 = arith.constant 0 : index
    %c0_0 = arith.constant 0 : index
    %0 = vector.load %arg1[%c0, %c0_0] : memref<64x4xf32, #tpu.memory_space<vmem>>, vector<64x4xf32>
    %c0_1 = arith.constant 0 : index
    %c0_2 = arith.constant 0 : index
    %1 = vector.load %arg2[%c0_1, %c0_2] : memref<4x128xf32, #tpu.memory_space<vmem>>, vector<4x128xf32>
    %cst = arith.constant dense<0.000000e+00> : vector<64x128xf32>
    %2 = tpu.matmul %0, %1, %cst {dimension_numbers = #tpu.dot_dimension_numbers<[1], [0], [0], [1], [0, 0, 1, 1], [], []>} : vector<64x4xf32>, vector<4x128xf32>, vector<64x128xf32> -> vector<64x128xf32>
    %c0_3 = arith.constant 0 : index
    %c0_4 = arith.constant 0 : index
    %3 = vector.load %arg4[%c0_3, %c0_4] : memref<1x128xf32, #tpu.memory_space<vmem>>, vector<1x128xf32>
    %4 = vector.broadcast %3 : vector<1x128xf32> to vector<64x128xf32>
    %5 = arith.addf %2, %4 : vector<64x128xf32>
    %c0_5 = arith.constant 0 : index
    %c0_6 = arith.constant 0 : index
    %6 = vector.load %arg8[%c0_5, %c0_6] : memref<64x128xf32, #tpu.memory_space<vmem>>, vector<64x128xf32>
    tpu.vector_store %arg8[%c0_5, %c0_6], %5 {strides = array<i32>} : memref<64x128xf32, #tpu.memory_space<vmem>>, vector<64x128xf32>,
    %c0_7 = arith.constant 0 : index
    %c0_8 = arith.constant 0 : index
    %7 = vector.load %arg3[%c0_7, %c0_8] : memref<32x128xf32, #tpu.memory_space<vmem>>, vector<32x128xf32>
    %cst_9 = arith.constant 0.000000e+00 : f32
    %8 = vector.broadcast %cst_9 : f32 to vector<8x32xf32>
    %cst_10 = arith.constant 0.000000e+00 : f32
    %9 = vector.broadcast %cst_10 : f32 to vector<8x32xf32>
    %c0_i32 = arith.constant 0 : i32
    %c8_i32 = arith.constant 8 : i32
    %10 = arith.muli %c0_i32, %c8_i32 : i32
    %11 = tpu.assume_multiple %10, 8 : i32
    %12 = arith.index_cast %11 : i32 to index
    %c0_11 = arith.constant 0 : index
    %13 = vector.load %arg8[%12, %c0_11] : memref<64x128xf32, #tpu.memory_space<vmem>>, vector<8x128xf32>
    %cst_12 = arith.constant dense<0.000000e+00> : vector<8x128xf32>
    %14 = tpu.matmul %8, %7, %cst_12 {dimension_numbers = #tpu.dot_dimension_numbers<[1], [0], [0], [1], [0, 0, 1, 1], [], []>} : vector<8x32xf32>, vector<32x128xf32>, vector<8x128xf32> -> vector<8x128xf32>
    %15 = arith.addf %13, %14 : vector<8x128xf32>
    %16 = arith.negf %15 : vector<8x128xf32>
    %17 = math.exp %16 : vector<8x128xf32>
    %cst_13 = arith.constant 1.000000e+00 : f32
    %18 = vector.broadcast %cst_13 : f32 to vector<8x128xf32>
    %19 = arith.addf %18, %17 : vector<8x128xf32>
    %20 = arith.divf %18, %19 : vector<8x128xf32>
    %21 = math.tanh %15 : vector<8x128xf32>
    %22 = vector.extract_strided_slice %20 {offsets = [0, 0], sizes = [8, 32], strides = [1, 1]} : vector<8x128xf32> to vector<8x32xf32>
    %23 = vector.extract_strided_slice %20 {offsets = [0, 32], sizes = [8, 32], strides = [1, 1]} : vector<8x128xf32> to vector<8x32xf32>
    %24 = vector.extract_strided_slice %21 {offsets = [0, 64], sizes = [8, 32], strides = [1, 1]} : vector<8x128xf32> to vector<8x32xf32>
    %25 = vector.extract_strided_slice %20 {offsets = [0, 96], sizes = [8, 32], strides = [1, 1]} : vector<8x128xf32> to vector<8x32xf32>
    %26 = arith.mulf %23, %9 : vector<8x32xf32>
    %27 = arith.mulf %22, %24 : vector<8x32xf32>
    %28 = arith.addf %26, %27 : vector<8x32xf32>
    %29 = math.tanh %28 : vector<8x32xf32>
    %30 = arith.mulf %25, %29 : vector<8x32xf32>
    %c1_i32 = arith.constant 1 : i32
    %c8_i32_14 = arith.constant 8 : i32
    %31 = arith.muli %c1_i32, %c8_i32_14 : i32
    %32 = tpu.assume_multiple %31, 8 : i32
    %33 = arith.index_cast %32 : i32 to index
    %c0_15 = arith.constant 0 : index
    %34 = vector.load %arg8[%33, %c0_15] : memref<64x128xf32, #tpu.memory_space<vmem>>, vector<8x128xf32>
    %cst_16 = arith.constant dense<0.000000e+00> : vector<8x128xf32>
    %35 = tpu.matmul %30, %7, %cst_16 {dimension_numbers = #tpu.dot_dimension_numbers<[1], [0], [0], [1], [0, 0, 1, 1], [], []>} : vector<8x32xf32>, vector<32x128xf32>, vector<8x128xf32> -> vector<8x128xf32>
    %36 = arith.addf %34, %35 : vector<8x128xf32>
    %37 = arith.negf %36 : vector<8x128xf32>
    %38 = math.exp %37 : vector<8x128xf32>
    %cst_17 = arith.constant 1.000000e+00 : f32
    %39 = vector.broadcast %cst_17 : f32 to vector<8x128xf32>
    %40 = arith.addf %39, %38 : vector<8x128xf32>
    %41 = arith.divf %39, %40 : vector<8x128xf32>
    %42 = math.tanh %36 : vector<8x128xf32>
    %43 = vector.extract_strided_slice %41 {offsets = [0, 0], sizes = [8, 32], strides = [1, 1]} : vector<8x128xf32> to vector<8x32xf32>
    %44 = vector.extract_strided_slice %41 {offsets = [0, 32], sizes = [8, 32], strides = [1, 1]} : vector<8x128xf32> to vector<8x32xf32>
    %45 = vector.extract_strided_slice %42 {offsets = [0, 64], sizes = [8, 32], strides = [1, 1]} : vector<8x128xf32> to vector<8x32xf32>
    %46 = vector.extract_strided_slice %41 {offsets = [0, 96], sizes = [8, 32], strides = [1, 1]} : vector<8x128xf32> to vector<8x32xf32>
    %47 = arith.mulf %44, %28 : vector<8x32xf32>
    %48 = arith.mulf %43, %45 : vector<8x32xf32>
    %49 = arith.addf %47, %48 : vector<8x32xf32>
    %50 = math.tanh %49 : vector<8x32xf32>
    %51 = arith.mulf %46, %50 : vector<8x32xf32>
    %c2_i32 = arith.constant 2 : i32
    %c8_i32_18 = arith.constant 8 : i32
    %52 = arith.muli %c2_i32, %c8_i32_18 : i32
    %53 = tpu.assume_multiple %52, 8 : i32
    %54 = arith.index_cast %53 : i32 to index
    %c0_19 = arith.constant 0 : index
    %55 = vector.load %arg8[%54, %c0_19] : memref<64x128xf32, #tpu.memory_space<vmem>>, vector<8x128xf32>
    %cst_20 = arith.constant dense<0.000000e+00> : vector<8x128xf32>
    %56 = tpu.matmul %51, %7, %cst_20 {dimension_numbers = #tpu.dot_dimension_numbers<[1], [0], [0], [1], [0, 0, 1, 1], [], []>} : vector<8x32xf32>, vector<32x128xf32>, vector<8x128xf32> -> vector<8x128xf32>
    %57 = arith.addf %55, %56 : vector<8x128xf32>
    %58 = arith.negf %57 : vector<8x128xf32>
    %59 = math.exp %58 : vector<8x128xf32>
    %cst_21 = arith.constant 1.000000e+00 : f32
    %60 = vector.broadcast %cst_21 : f32 to vector<8x128xf32>
    %61 = arith.addf %60, %59 : vector<8x128xf32>
    %62 = arith.divf %60, %61 : vector<8x128xf32>
    %63 = math.tanh %57 : vector<8x128xf32>
    %64 = vector.extract_strided_slice %62 {offsets = [0, 0], sizes = [8, 32], strides = [1, 1]} : vector<8x128xf32> to vector<8x32xf32>
    %65 = vector.extract_strided_slice %62 {offsets = [0, 32], sizes = [8, 32], strides = [1, 1]} : vector<8x128xf32> to vector<8x32xf32>
    %66 = vector.extract_strided_slice %63 {offsets = [0, 64], sizes = [8, 32], strides = [1, 1]} : vector<8x128xf32> to vector<8x32xf32>
    %67 = vector.extract_strided_slice %62 {offsets = [0, 96], sizes = [8, 32], strides = [1, 1]} : vector<8x128xf32> to vector<8x32xf32>
    %68 = arith.mulf %65, %49 : vector<8x32xf32>
    %69 = arith.mulf %64, %66 : vector<8x32xf32>
    %70 = arith.addf %68, %69 : vector<8x32xf32>
    %71 = math.tanh %70 : vector<8x32xf32>
    %72 = arith.mulf %67, %71 : vector<8x32xf32>
    %c3_i32 = arith.constant 3 : i32
    %c8_i32_22 = arith.constant 8 : i32
    %73 = arith.muli %c3_i32, %c8_i32_22 : i32
    %74 = tpu.assume_multiple %73, 8 : i32
    %75 = arith.index_cast %74 : i32 to index
    %c0_23 = arith.constant 0 : index
    %76 = vector.load %arg8[%75, %c0_23] : memref<64x128xf32, #tpu.memory_space<vmem>>, vector<8x128xf32>
    %cst_24 = arith.constant dense<0.000000e+00> : vector<8x128xf32>
    %77 = tpu.matmul %72, %7, %cst_24 {dimension_numbers = #tpu.dot_dimension_numbers<[1], [0], [0], [1], [0, 0, 1, 1], [], []>} : vector<8x32xf32>, vector<32x128xf32>, vector<8x128xf32> -> vector<8x128xf32>
    %78 = arith.addf %76, %77 : vector<8x128xf32>
    %79 = arith.negf %78 : vector<8x128xf32>
    %80 = math.exp %79 : vector<8x128xf32>
    %cst_25 = arith.constant 1.000000e+00 : f32
    %81 = vector.broadcast %cst_25 : f32 to vector<8x128xf32>
    %82 = arith.addf %81, %80 : vector<8x128xf32>
    %83 = arith.divf %81, %82 : vector<8x128xf32>
    %84 = math.tanh %78 : vector<8x128xf32>
    %85 = vector.extract_strided_slice %83 {offsets = [0, 0], sizes = [8, 32], strides = [1, 1]} : vector<8x128xf32> to vector<8x32xf32>
    %86 = vector.extract_strided_slice %83 {offsets = [0, 32], sizes = [8, 32], strides = [1, 1]} : vector<8x128xf32> to vector<8x32xf32>
    %87 = vector.extract_strided_slice %84 {offsets = [0, 64], sizes = [8, 32], strides = [1, 1]} : vector<8x128xf32> to vector<8x32xf32>
    %88 = vector.extract_strided_slice %83 {offsets = [0, 96], sizes = [8, 32], strides = [1, 1]} : vector<8x128xf32> to vector<8x32xf32>
    %89 = arith.mulf %86, %70 : vector<8x32xf32>
    %90 = arith.mulf %85, %87 : vector<8x32xf32>
    %91 = arith.addf %89, %90 : vector<8x32xf32>
    %92 = math.tanh %91 : vector<8x32xf32>
    %93 = arith.mulf %88, %92 : vector<8x32xf32>
    %c4_i32 = arith.constant 4 : i32
    %c8_i32_26 = arith.constant 8 : i32
    %94 = arith.muli %c4_i32, %c8_i32_26 : i32
    %95 = tpu.assume_multiple %94, 8 : i32
    %96 = arith.index_cast %95 : i32 to index
    %c0_27 = arith.constant 0 : index
    %97 = vector.load %arg8[%96, %c0_27] : memref<64x128xf32, #tpu.memory_space<vmem>>, vector<8x128xf32>
    %cst_28 = arith.constant dense<0.000000e+00> : vector<8x128xf32>
    %98 = tpu.matmul %93, %7, %cst_28 {dimension_numbers = #tpu.dot_dimension_numbers<[1], [0], [0], [1], [0, 0, 1, 1], [], []>} : vector<8x32xf32>, vector<32x128xf32>, vector<8x128xf32> -> vector<8x128xf32>
    %99 = arith.addf %97, %98 : vector<8x128xf32>
    %100 = arith.negf %99 : vector<8x128xf32>
    %101 = math.exp %100 : vector<8x128xf32>
    %cst_29 = arith.constant 1.000000e+00 : f32
    %102 = vector.broadcast %cst_29 : f32 to vector<8x128xf32>
    %103 = arith.addf %102, %101 : vector<8x128xf32>
    %104 = arith.divf %102, %103 : vector<8x128xf32>
    %105 = math.tanh %99 : vector<8x128xf32>
    %106 = vector.extract_strided_slice %104 {offsets = [0, 0], sizes = [8, 32], strides = [1, 1]} : vector<8x128xf32> to vector<8x32xf32>
    %107 = vector.extract_strided_slice %104 {offsets = [0, 32], sizes = [8, 32], strides = [1, 1]} : vector<8x128xf32> to vector<8x32xf32>
    %108 = vector.extract_strided_slice %105 {offsets = [0, 64], sizes = [8, 32], strides = [1, 1]} : vector<8x128xf32> to vector<8x32xf32>
    %109 = vector.extract_strided_slice %104 {offsets = [0, 96], sizes = [8, 32], strides = [1, 1]} : vector<8x128xf32> to vector<8x32xf32>
    %110 = arith.mulf %107, %91 : vector<8x32xf32>
    %111 = arith.mulf %106, %108 : vector<8x32xf32>
    %112 = arith.addf %110, %111 : vector<8x32xf32>
    %113 = math.tanh %112 : vector<8x32xf32>
    %114 = arith.mulf %109, %113 : vector<8x32xf32>
    %c5_i32 = arith.constant 5 : i32
    %c8_i32_30 = arith.constant 8 : i32
    %115 = arith.muli %c5_i32, %c8_i32_30 : i32
    %116 = tpu.assume_multiple %115, 8 : i32
    %117 = arith.index_cast %116 : i32 to index
    %c0_31 = arith.constant 0 : index
    %118 = vector.load %arg8[%117, %c0_31] : memref<64x128xf32, #tpu.memory_space<vmem>>, vector<8x128xf32>
    %cst_32 = arith.constant dense<0.000000e+00> : vector<8x128xf32>
    %119 = tpu.matmul %114, %7, %cst_32 {dimension_numbers = #tpu.dot_dimension_numbers<[1], [0], [0], [1], [0, 0, 1, 1], [], []>} : vector<8x32xf32>, vector<32x128xf32>, vector<8x128xf32> -> vector<8x128xf32>
    %120 = arith.addf %118, %119 : vector<8x128xf32>
    %121 = arith.negf %120 : vector<8x128xf32>
    %122 = math.exp %121 : vector<8x128xf32>
    %cst_33 = arith.constant 1.000000e+00 : f32
    %123 = vector.broadcast %cst_33 : f32 to vector<8x128xf32>
    %124 = arith.addf %123, %122 : vector<8x128xf32>
    %125 = arith.divf %123, %124 : vector<8x128xf32>
    %126 = math.tanh %120 : vector<8x128xf32>
    %127 = vector.extract_strided_slice %125 {offsets = [0, 0], sizes = [8, 32], strides = [1, 1]} : vector<8x128xf32> to vector<8x32xf32>
    %128 = vector.extract_strided_slice %125 {offsets = [0, 32], sizes = [8, 32], strides = [1, 1]} : vector<8x128xf32> to vector<8x32xf32>
    %129 = vector.extract_strided_slice %126 {offsets = [0, 64], sizes = [8, 32], strides = [1, 1]} : vector<8x128xf32> to vector<8x32xf32>
    %130 = vector.extract_strided_slice %125 {offsets = [0, 96], sizes = [8, 32], strides = [1, 1]} : vector<8x128xf32> to vector<8x32xf32>
    %131 = arith.mulf %128, %112 : vector<8x32xf32>
    %132 = arith.mulf %127, %129 : vector<8x32xf32>
    %133 = arith.addf %131, %132 : vector<8x32xf32>
    %134 = math.tanh %133 : vector<8x32xf32>
    %135 = arith.mulf %130, %134 : vector<8x32xf32>
    %c6_i32 = arith.constant 6 : i32
    %c8_i32_34 = arith.constant 8 : i32
    %136 = arith.muli %c6_i32, %c8_i32_34 : i32
    %137 = tpu.assume_multiple %136, 8 : i32
    %138 = arith.index_cast %137 : i32 to index
    %c0_35 = arith.constant 0 : index
    %139 = vector.load %arg8[%138, %c0_35] : memref<64x128xf32, #tpu.memory_space<vmem>>, vector<8x128xf32>
    %cst_36 = arith.constant dense<0.000000e+00> : vector<8x128xf32>
    %140 = tpu.matmul %135, %7, %cst_36 {dimension_numbers = #tpu.dot_dimension_numbers<[1], [0], [0], [1], [0, 0, 1, 1], [], []>} : vector<8x32xf32>, vector<32x128xf32>, vector<8x128xf32> -> vector<8x128xf32>
    %141 = arith.addf %139, %140 : vector<8x128xf32>
    %142 = arith.negf %141 : vector<8x128xf32>
    %143 = math.exp %142 : vector<8x128xf32>
    %cst_37 = arith.constant 1.000000e+00 : f32
    %144 = vector.broadcast %cst_37 : f32 to vector<8x128xf32>
    %145 = arith.addf %144, %143 : vector<8x128xf32>
    %146 = arith.divf %144, %145 : vector<8x128xf32>
    %147 = math.tanh %141 : vector<8x128xf32>
    %148 = vector.extract_strided_slice %146 {offsets = [0, 0], sizes = [8, 32], strides = [1, 1]} : vector<8x128xf32> to vector<8x32xf32>
    %149 = vector.extract_strided_slice %146 {offsets = [0, 32], sizes = [8, 32], strides = [1, 1]} : vector<8x128xf32> to vector<8x32xf32>
    %150 = vector.extract_strided_slice %147 {offsets = [0, 64], sizes = [8, 32], strides = [1, 1]} : vector<8x128xf32> to vector<8x32xf32>
    %151 = vector.extract_strided_slice %146 {offsets = [0, 96], sizes = [8, 32], strides = [1, 1]} : vector<8x128xf32> to vector<8x32xf32>
    %152 = arith.mulf %149, %133 : vector<8x32xf32>
    %153 = arith.mulf %148, %150 : vector<8x32xf32>
    %154 = arith.addf %152, %153 : vector<8x32xf32>
    %155 = math.tanh %154 : vector<8x32xf32>
    %156 = arith.mulf %151, %155 : vector<8x32xf32>
    %c7_i32 = arith.constant 7 : i32
    %c8_i32_38 = arith.constant 8 : i32
    %157 = arith.muli %c7_i32, %c8_i32_38 : i32
    %158 = tpu.assume_multiple %157, 8 : i32
    %159 = arith.index_cast %158 : i32 to index
    %c0_39 = arith.constant 0 : index
    %160 = vector.load %arg8[%159, %c0_39] : memref<64x128xf32, #tpu.memory_space<vmem>>, vector<8x128xf32>
    %cst_40 = arith.constant dense<0.000000e+00> : vector<8x128xf32>
    %161 = tpu.matmul %156, %7, %cst_40 {dimension_numbers = #tpu.dot_dimension_numbers<[1], [0], [0], [1], [0, 0, 1, 1], [], []>} : vector<8x32xf32>, vector<32x128xf32>, vector<8x128xf32> -> vector<8x128xf32>
    %162 = arith.addf %160, %161 : vector<8x128xf32>
    %163 = arith.negf %162 : vector<8x128xf32>
    %164 = math.exp %163 : vector<8x128xf32>
    %cst_41 = arith.constant 1.000000e+00 : f32
    %165 = vector.broadcast %cst_41 : f32 to vector<8x128xf32>
    %166 = arith.addf %165, %164 : vector<8x128xf32>
    %167 = arith.divf %165, %166 : vector<8x128xf32>
    %168 = math.tanh %162 : vector<8x128xf32>
    %169 = vector.extract_strided_slice %167 {offsets = [0, 0], sizes = [8, 32], strides = [1, 1]} : vector<8x128xf32> to vector<8x32xf32>
    %170 = vector.extract_strided_slice %167 {offsets = [0, 32], sizes = [8, 32], strides = [1, 1]} : vector<8x128xf32> to vector<8x32xf32>
    %171 = vector.extract_strided_slice %168 {offsets = [0, 64], sizes = [8, 32], strides = [1, 1]} : vector<8x128xf32> to vector<8x32xf32>
    %172 = vector.extract_strided_slice %167 {offsets = [0, 96], sizes = [8, 32], strides = [1, 1]} : vector<8x128xf32> to vector<8x32xf32>
    %173 = arith.mulf %170, %154 : vector<8x32xf32>
    %174 = arith.mulf %169, %171 : vector<8x32xf32>
    %175 = arith.addf %173, %174 : vector<8x32xf32>
    %176 = math.tanh %175 : vector<8x32xf32>
    %177 = arith.mulf %172, %176 : vector<8x32xf32>
    %c8_i32_42 = arith.constant 8 : i32
    %c0_43 = arith.constant 0 : index
    %c0_44 = arith.constant 0 : index
    %178 = vector.load %arg5[%c0_43, %c0_44] : memref<1x32xf32, #tpu.memory_space<vmem>>, vector<1x32xf32>
    %179 = vector.broadcast %178 : vector<1x32xf32> to vector<8x32xf32>
    %180 = arith.mulf %177, %179 : vector<8x32xf32>
    %cst_45 = arith.constant dense<0.000000e+00> : vector<8xf32>
    %181 = vector.multi_reduction <add>, %180, %cst_45 [1] : vector<8x32xf32> to vector<8xf32>
    %182 = vector.shape_cast %181 : vector<8xf32> to vector<8x1xf32>
    %c0_46 = arith.constant 0 : index
    %c0_47 = arith.constant 0 : index
    %183 = vector.load %arg6[%c0_46, %c0_47] : memref<1x1xf32, #tpu.memory_space<vmem>>, vector<1x1xf32>
    %184 = vector.broadcast %183 : vector<1x1xf32> to vector<8x1xf32>
    %185 = arith.addf %182, %184 : vector<8x1xf32>
    %c0_48 = arith.constant 0 : index
    %c0_49 = arith.constant 0 : index
    %186 = vector.load %arg7[%c0_48, %c0_49] : memref<8x1xf32, #tpu.memory_space<vmem>>, vector<8x1xf32>
    tpu.vector_store %arg7[%c0_48, %c0_49], %185 {strides = array<i32>} : memref<8x1xf32, #tpu.memory_space<vmem>>, vector<8x1xf32>,
    return
  }
  func.func @transform_0(%arg0: i32) -> (i32, i32) {
    %c0_i32 = arith.constant 0 : i32
    %c0_i32_0 = arith.constant 0 : i32
    return %arg0, %c0_i32 : i32, i32
  }
  func.func @transform_1(%arg0: i32) -> (i32, i32) {
    %c0_i32 = arith.constant 0 : i32
    %c0_i32_0 = arith.constant 0 : i32
    %c0_i32_1 = arith.constant 0 : i32
    return %c0_i32, %c0_i32_0 : i32, i32
  }
  func.func @transform_2(%arg0: i32) -> (i32, i32) {
    %c0_i32 = arith.constant 0 : i32
    %c0_i32_0 = arith.constant 0 : i32
    %c0_i32_1 = arith.constant 0 : i32
    return %c0_i32, %c0_i32_0 : i32, i32
  }
  func.func @transform_3(%arg0: i32) -> (i32, i32) {
    %c0_i32 = arith.constant 0 : i32
    %c0_i32_0 = arith.constant 0 : i32
    %c0_i32_1 = arith.constant 0 : i32
    return %c0_i32, %c0_i32_0 : i32, i32
  }
  func.func @transform_4(%arg0: i32) -> (i32, i32) {
    %c0_i32 = arith.constant 0 : i32
    %c0_i32_0 = arith.constant 0 : i32
    %c0_i32_1 = arith.constant 0 : i32
    return %c0_i32, %c0_i32_0 : i32, i32
  }
  func.func @transform_5(%arg0: i32) -> (i32, i32) {
    %c0_i32 = arith.constant 0 : i32
    %c0_i32_0 = arith.constant 0 : i32
    %c0_i32_1 = arith.constant 0 : i32
    return %c0_i32, %c0_i32_0 : i32, i32
  }
  func.func @transform_6(%arg0: i32) -> (i32, i32) {
    %c0_i32 = arith.constant 0 : i32
    %c0_i32_0 = arith.constant 0 : i32
    return %arg0, %c0_i32 : i32, i32
  }
}

</mosaic_0001>

<bundles_post_ra>
// kernel: tpu_custom_call.1
= control target key start
LH: loop header
LB: loop body
LE: loop exit
PB: predicated region body
PF: predicated region fallthrough
CT: control target
= control target key end

     0   :  { %vm66_vm0 = vcmask 1043456   ;;  %vm41_vm1 = vcmask 31744   ;;  %v1279_v0 = vmov 0.0   ;;  %vm1280_vm2 = vmmov 0   ;;  %s1281_s11 = smov 64   ;;  %s1283_s25 = smov 96   ;;  %s1529_s1 = inlined_call_operand.vmem [shape: f32[4,128], index: 1, kind: input, shape index: {}]   ;;  %s1530_s2 = inlined_call_operand.vmem [shape: f32[32,128], index: 2, kind: input, shape index: {}]   ;;  %s1531_s0 = inlined_call_operand.vmem [shape: f32[64,4], index: 0, kind: input, shape index: {}]   ;;  %s1532_s3 = inlined_call_operand.vmem [shape: f32[1,128], index: 3, kind: input, shape index: {}]   ;;  %s1533_s4 = inlined_call_operand.vmem [shape: f32[1,32], index: 4, kind: input, shape index: {}]   ;;  %s1534_s5 = inlined_call_operand.<no memory space> [shape: f32[1,1], index: 5, kind: input, shape index: {}]   ;;  %s1535_s6 = inlined_call_operand.vmem [shape: f32[8,1], index: 6, kind: output, shape index: {}]  }
   0x1   :  { %1122 = vmatprep.subr.mxu1 %v1279_v0  ;;  %v33_v1 = vld [vmem:[%s1529_s1] sm:$0xf]  ;;  %v1326_v2 = vld [vmem:[%s1530_s2 + $0x18] sm:$0xff]  ;;  %1130 = vmatprep.mubr.msk.f32.mxu1 %vm1280_vm2, %v1279_v0  ;;  %v26_v4 = vld [vmem:[%s1531_s0 + $0x8] sm:$0xff]  ;;  %vm188_vm3 = vcmask 261120   ;;  %vm1026_vm4 = vcmask 7168  }
   0x2   :  { %v25_v3 = vld [vmem:[%s1531_s0] sm:$0xff]  ;;  %1108 = vmatprep.subr.msk.mxu0 %vm66_vm0, %v33_v1  ;;  %1123 = vmatpush3.msra.mxu1 %v1326_v2  ;;  %v1340_v5 = vld [vmem:[%s1530_s2 + $0x10] sm:$0xff]  ;;  %v1348_v6 = vld [vmem:[%s1530_s2 + $0x8] sm:$0xff] }
   0x3   :  { %1109 = vmatpush3.msk.msra.mxu0 %vm66_vm0, %v33_v1  ;;  %1110 = vmatprep.mubr.msk.f32.mxu0 %vm41_vm1, %v25_v3  ;;  %v1356_v7 = vld [vmem:[%s1530_s2] sm:$0xff]  ;;  %v27_v43 = vld [vmem:[%s1531_s0 + $0x10] sm:$0xff]  ;;  %v28_v44 = vld [vmem:[%s1531_s0 + $0x18] sm:$0xff] }
   0x4   :  { %1124 = vmatprep.subr.mxu1 %v1279_v0  ;;  %1111 = vmatmul.mubr.msk.f32.vlgmr.msra.gmra.mxu0 %vm41_vm1, %v26_v4  ;;  %v1384_v9 = vld [vmem:[%s1532_s3] ss:$0 sm:$0xff]  ;;  %s1282_s3 = smov 32   ;;  %v30_v46 = vld [vmem:[%s1531_s0 + $0x28] sm:$0xff]  ;;  %v31_v47 = vld [vmem:[%s1531_s0 + $0x30] sm:$0xff] }
   0x5   :  { %1125 = vmatpush3.msra.mxu1 %v1340_v5  ;;  %1144 = vmatprep.subr.mxu0 %v1279_v0  ;;  %v29_v45 = vld [vmem:[%s1531_s0 + $0x20] sm:$0xff]  ;;  %v32_v48 = vld [vmem:[%s1531_s0 + $0x38] sm:$0xff] }
   0x6   :  { %1126 = vmatprep.subr.mxu1 %v1279_v0  ;;  %1145 = vmatpush3.msra.mxu0 %v1326_v2 }
   0x7   :  { %1127 = vmatpush3.msra.mxu1 %v1348_v6  ;;  %1146 = vmatprep.subr.mxu0 %v1279_v0 }
   0x8   :  { %1128 = vmatprep.subr.mxu1 %v1279_v0  ;;  %1147 = vmatpush3.msra.mxu0 %v1340_v5 }
   0x9   :  { %1129 = vmatpush3.msra.mxu1 %v1356_v7  ;;  %1148 = vmatprep.subr.mxu0 %v1279_v0 }
   0xa   :  { %1131 = vmatmul.mubr.f32.vlgmr.msra.gmra.mxu1 %v1279_v0  ;;  %1133 = vmatprep.subr.mxu1 %v1279_v0 }
   0xb   :  { %1134 = vmatpush3.msra.mxu1 %v1326_v2  ;;  %1141 = vmatprep.mubr.msk.f32.mxu1 %vm1280_vm2, %v1279_v0 }
   0xc   :  { %1135 = vmatprep.subr.mxu1 %v1279_v0  ;;  %1149 = vmatpush3.msra.mxu0 %v1348_v6 }
   0xd   :  { %1136 = vmatpush3.msra.mxu1 %v1340_v5  ;;  %1150 = vmatprep.subr.mxu0 %v1279_v0 }
   0xe   :  { %1137 = vmatprep.subr.mxu1 %v1279_v0  ;;  %1151 = vmatpush3.msra.mxu0 %v1356_v7 }
   0xf   :  { %1138 = vmatpush3.msra.mxu1 %v1348_v6  ;;  %1166 = vmatprep.subr.mxu0 %v1279_v0 }
  0x10   :  { %1139 = vmatprep.subr.mxu1 %v1279_v0  ;;  %1113 = vmatprep.mubr.msk.f32.mxu0 %vm41_vm1, %v27_v43 }
  0x11   :  { %1140 = vmatpush3.msra.mxu1 %v1356_v7  ;;  %1114 = vmatmul.mubr.msk.f32.gmra.mxu0 %vm41_vm1, %v28_v44 }
  0x12   :  { %1155 = vmatprep.subr.mxu1 %v1279_v0  ;;  %1116 = vmatprep.mubr.msk.f32.mxu0 %vm41_vm1, %v29_v45 }
  0x15   :  { %1117 = vmatmul.mubr.msk.f32.gmra.mxu0 %vm41_vm1, %v30_v46 }
  0x16   :  { %1119 = vmatprep.mubr.msk.f32.mxu0 %vm41_vm1, %v31_v47 }
  0x19   :  { %1120 = vmatmul.mubr.msk.f32.gmra.mxu0 %vm41_vm1, %v32_v48 }
  0x1a   :  { %1152 = vmatprep.mubr.msk.f32.mxu0 %vm1280_vm2, %v1279_v0 }
  0xc4   :  { %v1112_v8 = vpop.f32.mrf.mxu0 }
  0xc5   :  { %v142_v29 = vadd.f32 %v1112_v8, %v1384_v9 }
  0xc6   :  { %v136_v10 = vpop.f32.mrf.mxu0 }
  0xc7   :  { %v137_v11 = vadd.f32 %v1384_v9, %v136_v10 }
  0xca   :  { %v258_v12 = vpop.f32.mrf.mxu1 }
  0xcb   :  { %v262_v13 = vadd.f32 %v258_v12, %v137_v11 }
  0xcc   :  { %v1132_v14 = vpop.f32.mrf.mxu1 }
  0xcd   :  { %1215 = vtanh.f32 %v262_v13  ;;  %v1042_v16 = vmul.f32 -1.442695, %v262_v13 }
  0xcf   :  { %1217 = vpow2.f32 %v1042_v16 }
  0xd1   :  { %v1115_v53 = vpop.f32.mrf.mxu0 }
  0xd3   :  { %v146_v54 = vpop.f32.mrf.mxu0 }
  0xd4   :  { %v147_v59 = vadd.f32 %v1384_v9, %v146_v54 }
  0xd5   :  { %v1444_v55 = vpop.f32.mrf.mxu0 }
  0xd7   :  { %v1446_v56 = vpop.f32.mrf.mxu0 }
  0xd9   :  { %v1448_v57 = vpop.f32.mrf.mxu0 }
  0xda   :  { %v1216_v15 = vpop.eup %1215 }
  0xdb   :  { %272 = vrot.lane.b32.xlu0 %v1216_v15, %s1281_s11  ;;  %v1450_v58 = vpop.f32.mrf.mxu0 }
  0xdc   :  { %v1218_v17 = vpop.eup %1217 }
  0xdd   :  { %v266_v18 = vadd.f32 1.0, %v1218_v17 }
  0xdf   :  { %1219 = vrcp.f32 %v266_v18 }
  0xec   :  { %v1220_v19 = vpop.eup %1219 }
  0xed   :  { %v270_v22 = vmul.f32 0.0, %v1220_v19 }
 0x14d   :  { %v273_v20 = vpop.permute.xlu0 %272 }
 0x14e   :  { %v275_v21 = vmul.f32 %v1220_v19, %v273_v20 }
 0x150   :  { %277 = vrot.lane.b32.xlu0 %v275_v21, %s1282_s3 }
 0x1c2   :  { %v278_v23 = vpop.permute.xlu0 %277 }
 0x1c3   :  { %v280_v24 = vadd.f32 %v278_v23, %v270_v22 }
 0x1c5   :  { %1221 = vtanh.f32 %v280_v24 }
 0x1d2   :  { %v1222_v25 = vpop.eup %1221 }
 0x1d3   :  { %283 = vrot.lane.b32.xlu1 %v1222_v25, %s1281_s11 }
 0x245   :  { %v284_v26 = vpop.permute.xlu1 %283 }
 0x246   :  { %v286_v27 = vmul.f32 %v1220_v19, %v284_v26  ;;  %v152_v19 = vadd.f32 %v1115_v53, %v1384_v9 }
 0x248   :  { %290 = vrot.lane.b32.xlu1 %v286_v27, %s1282_s3 }
 0x2ba   :  { %v291_v28 = vpop.permute.xlu1 %290 }
 0x2bb   :  { %1142 = vmatmul.mubr.msk.f32.vlgmr.msra.gmra.mxu1 %vm188_vm3, %v291_v28 }
 0x2bc   :  { %1156 = vmatpush3.msra.mxu1 %v1326_v2  ;;  %1163 = vmatprep.mubr.msk.f32.mxu1 %vm1280_vm2, %v1279_v0 }
 0x2bd   :  { %1157 = vmatprep.subr.mxu1 %v1279_v0 }
 0x2be   :  { %1158 = vmatpush3.msra.mxu1 %v1340_v5 }
 0x2bf   :  { %1159 = vmatprep.subr.mxu1 %v1279_v0 }
 0x2c0   :  { %1160 = vmatpush3.msra.mxu1 %v1348_v6 }
 0x2c1   :  { %1161 = vmatprep.subr.mxu1 %v1279_v0 }
 0x2c2   :  { %1162 = vmatpush3.msra.mxu1 %v1356_v7 }
 0x2c3   :  { %1177 = vmatprep.subr.mxu1 %v1279_v0 }
 0x37b   :  { %v360_v30 = vpop.f32.mrf.mxu1 }
 0x37c   :  { %v364_v31 = vadd.f32 %v360_v30, %v142_v29 }
 0x37d   :  { %v1143_v32 = vpop.f32.mrf.mxu1 }
 0x37e   :  { %1223 = vtanh.f32 %v364_v31  ;;  %v1044_v34 = vmul.f32 -1.442695, %v364_v31 }
 0x380   :  { %1225 = vpow2.f32 %v1044_v34 }
 0x38b   :  { %v1224_v33 = vpop.eup %1223 }
 0x38c   :  { %374 = vrot.lane.b32.xlu0 %v1224_v33, %s1281_s11 }
 0x38d   :  { %v1226_v35 = vpop.eup %1225 }
 0x38e   :  { %v368_v36 = vadd.f32 1.0, %v1226_v35 }
 0x390   :  { %1227 = vrcp.f32 %v368_v36 }
 0x39d   :  { %v1228_v37 = vpop.eup %1227 }
 0x39e   :  { %v372_v40 = vmul.f32 %v1228_v37, %v280_v24 }
 0x3fe   :  { %v375_v38 = vpop.permute.xlu0 %374 }
 0x3ff   :  { %v377_v39 = vmul.f32 %v1228_v37, %v375_v38 }
 0x401   :  { %379 = vrot.lane.b32.xlu1 %v377_v39, %s1282_s3 }
 0x473   :  { %v380_v41 = vpop.permute.xlu1 %379 }
 0x474   :  { %v382_v42 = vadd.f32 %v380_v41, %v372_v40 }
 0x476   :  { %1229 = vtanh.f32 %v382_v42 }
 0x483   :  { %v1230_v49 = vpop.eup %1229 }
 0x484   :  { %385 = vrot.lane.b32.xlu0 %v1230_v49, %s1281_s11 }
 0x4f6   :  { %v386_v50 = vpop.permute.xlu0 %385 }
 0x4f7   :  { %v388_v51 = vmul.f32 %v1228_v37, %v386_v50  ;;  %v157_v37 = vadd.f32 %v1384_v9, %v1446_v56  ;;  %v162_v56 = vadd.f32 %v1444_v55, %v1384_v9 }
 0x4f9   :  { %392 = vrot.lane.b32.xlu1 %v388_v51, %s1282_s3 }
 0x56b   :  { %v393_v52 = vpop.permute.xlu1 %392 }
 0x56c   :  { %1153 = vmatmul.mubr.msk.f32.vlgmr.msra.gmra.mxu0 %vm188_vm3, %v393_v52 }
 0x56d   :  { %1167 = vmatpush3.msra.mxu0 %v1326_v2  ;;  %1174 = vmatprep.mubr.msk.f32.mxu0 %vm1280_vm2, %v1279_v0 }
 0x56e   :  { %1168 = vmatprep.subr.mxu0 %v1279_v0 }
 0x56f   :  { %1169 = vmatpush3.msra.mxu0 %v1340_v5 }
 0x570   :  { %1170 = vmatprep.subr.mxu0 %v1279_v0 }
 0x571   :  { %1171 = vmatpush3.msra.mxu0 %v1348_v6 }
 0x572   :  { %1172 = vmatprep.subr.mxu0 %v1279_v0 }
 0x573   :  { %1173 = vmatpush3.msra.mxu0 %v1356_v7 }
 0x574   :  { %1188 = vmatprep.subr.mxu0 %v1279_v0 }
 0x62c   :  { %v462_v60 = vpop.f32.mrf.mxu0 }
 0x62d   :  { %v466_v61 = vadd.f32 %v462_v60, %v147_v59 }
 0x62e   :  { %v1154_v62 = vpop.f32.mrf.mxu0 }
 0x62f   :  { %1231 = vtanh.f32 %v466_v61  ;;  %v1046_v1 = vmul.f32 -1.442695, %v466_v61 }
 0x631   :  { %1233 = vpow2.f32 %v1046_v1 }
 0x63c   :  { %v1232_v63 = vpop.eup %1231 }
 0x63d   :  { %476 = vrot.lane.b32.xlu0 %v1232_v63, %s1281_s11 }
 0x63e   :  { %v1234_v3 = vpop.eup %1233 }
 0x63f   :  { %v470_v4 = vadd.f32 1.0, %v1234_v3 }
 0x641   :  { %1235 = vrcp.f32 %v470_v4 }
 0x64e   :  { %v1236_v8 = vpop.eup %1235 }
 0x64f   :  { %v474_v12 = vmul.f32 %v1236_v8, %v382_v42 }
 0x6af   :  { %v477_v10 = vpop.permute.xlu0 %476 }
 0x6b0   :  { %v479_v11 = vmul.f32 %v1236_v8, %v477_v10 }
 0x6b2   :  { %481 = vrot.lane.b32.xlu1 %v479_v11, %s1282_s3 }
 0x724   :  { %v482_v13 = vpop.permute.xlu1 %481 }
 0x725   :  { %v484_v14 = vadd.f32 %v482_v13, %v474_v12  ;;  %v167_v12 = vadd.f32 %v1384_v9, %v1450_v58 }
 0x727   :  { %1237 = vtanh.f32 %v484_v14 }
 0x734   :  { %v1238_v15 = vpop.eup %1237 }
 0x735   :  { %487 = vrot.lane.b32.xlu0 %v1238_v15, %s1281_s11 }
 0x7a7   :  { %v488_v16 = vpop.permute.xlu0 %487 }
 0x7a8   :  { %v490_v17 = vmul.f32 %v1236_v8, %v488_v16 }
 0x7aa   :  { %494 = vrot.lane.b32.xlu1 %v490_v17, %s1282_s3 }
 0x81c   :  { %v495_v18 = vpop.permute.xlu1 %494 }
 0x81d   :  { %1164 = vmatmul.mubr.msk.f32.vlgmr.msra.gmra.mxu1 %vm188_vm3, %v495_v18 }
 0x81e   :  { %1178 = vmatpush3.msra.mxu1 %v1326_v2  ;;  %1185 = vmatprep.mubr.msk.f32.mxu1 %vm1280_vm2, %v1279_v0 }
 0x81f   :  { %1179 = vmatprep.subr.mxu1 %v1279_v0 }
 0x820   :  { %1180 = vmatpush3.msra.mxu1 %v1340_v5 }
 0x821   :  { %1181 = vmatprep.subr.mxu1 %v1279_v0 }
 0x822   :  { %1182 = vmatpush3.msra.mxu1 %v1348_v6 }
 0x823   :  { %1183 = vmatprep.subr.mxu1 %v1279_v0 }
 0x824   :  { %1184 = vmatpush3.msra.mxu1 %v1356_v7 }
 0x825   :  { %1199 = vmatprep.subr.mxu1 %v1279_v0 }
 0x8dd   :  { %v564_v20 = vpop.f32.mrf.mxu1 }
 0x8de   :  { %v568_v21 = vadd.f32 %v564_v20, %v152_v19 }
 0x8df   :  { %v1165_v22 = vpop.f32.mrf.mxu1 }
 0x8e0   :  { %1239 = vtanh.f32 %v568_v21  ;;  %v1048_v24 = vmul.f32 -1.442695, %v568_v21 }
 0x8e2   :  { %1241 = vpow2.f32 %v1048_v24 }
 0x8ed   :  { %v1240_v23 = vpop.eup %1239 }
 0x8ee   :  { %578 = vrot.lane.b32.xlu0 %v1240_v23, %s1281_s11 }
 0x8ef   :  { %v1242_v25 = vpop.eup %1241 }
 0x8f0   :  { %v572_v26 = vadd.f32 1.0, %v1242_v25 }
 0x8f2   :  { %1243 = vrcp.f32 %v572_v26 }
 0x8ff   :  { %v1244_v27 = vpop.eup %1243 }
 0x900   :  { %v576_v30 = vmul.f32 %v1244_v27, %v484_v14 }
 0x960   :  { %v579_v28 = vpop.permute.xlu0 %578 }
 0x961   :  { %v581_v29 = vmul.f32 %v1244_v27, %v579_v28 }
 0x963   :  { %583 = vrot.lane.b32.xlu1 %v581_v29, %s1282_s3  ;;  %v172_v29 = vadd.f32 %v1448_v57, %v1384_v9  ;;  %v1057_v9 = vld [vmem:[%s1533_s4] ss:$0 sm:$0xff] }
 0x9d5   :  { %v584_v31 = vpop.permute.xlu1 %583 }
 0x9d6   :  { %v586_v32 = vadd.f32 %v584_v31, %v576_v30 }
 0x9d8   :  { %1245 = vtanh.f32 %v586_v32 }
 0x9e5   :  { %v1246_v33 = vpop.eup %1245 }
 0x9e6   :  { %589 = vrot.lane.b32.xlu0 %v1246_v33, %s1281_s11 }
 0xa58   :  { %v590_v34 = vpop.permute.xlu0 %589 }
 0xa59   :  { %v592_v35 = vmul.f32 %v1244_v27, %v590_v34 }
 0xa5b   :  { %596 = vrot.lane.b32.xlu1 %v592_v35, %s1282_s3 }
 0xacd   :  { %v597_v36 = vpop.permute.xlu1 %596 }
 0xace   :  { %1175 = vmatmul.mubr.msk.f32.vlgmr.msra.gmra.mxu0 %vm188_vm3, %v597_v36 }
 0xacf   :  { %1189 = vmatpush3.msra.mxu0 %v1326_v2  ;;  %1196 = vmatprep.mubr.msk.f32.mxu0 %vm1280_vm2, %v1279_v0 }
 0xad0   :  { %1190 = vmatprep.subr.mxu0 %v1279_v0 }
 0xad1   :  { %1191 = vmatpush3.msra.mxu0 %v1340_v5 }
 0xad2   :  { %1192 = vmatprep.subr.mxu0 %v1279_v0 }
 0xad3   :  { %1193 = vmatpush3.msra.mxu0 %v1348_v6 }
 0xad4   :  { %1194 = vmatprep.subr.mxu0 %v1279_v0 }
 0xad5   :  { %1195 = vmatpush3.msra.mxu0 %v1356_v7 }
 0xb8e   :  { %v666_v38 = vpop.f32.mrf.mxu0 }
 0xb8f   :  { %v670_v39 = vadd.f32 %v666_v38, %v157_v37 }
 0xb90   :  { %v1176_v40 = vpop.f32.mrf.mxu0 }
 0xb91   :  { %1247 = vtanh.f32 %v670_v39  ;;  %v1050_v42 = vmul.f32 -1.442695, %v670_v39 }
 0xb93   :  { %1249 = vpow2.f32 %v1050_v42 }
 0xb9e   :  { %v1248_v41 = vpop.eup %1247 }
 0xb9f   :  { %680 = vrot.lane.b32.xlu0 %v1248_v41, %s1281_s11 }
 0xba0   :  { %v1250_v43 = vpop.eup %1249 }
 0xba1   :  { %v674_v44 = vadd.f32 1.0, %v1250_v43  ;;  %v11_v43 = vstv %s1534_s5 }
 0xba2   :  { %12 = vst [vmem:[#allocation3] sm:$0x1] %v11_v43 }
 0xba3   :  { %1251 = vrcp.f32 %v674_v44 }
 0xbb0   :  { %v1252_v45 = vpop.eup %1251 }
 0xbb1   :  { %v678_v48 = vmul.f32 %v1252_v45, %v586_v32 }
 0xc11   :  { %v681_v46 = vpop.permute.xlu0 %680 }
 0xc12   :  { %v683_v47 = vmul.f32 %v1252_v45, %v681_v46 }
 0xc14   :  { %685 = vrot.lane.b32.xlu1 %v683_v47, %s1282_s3 }
 0xc86   :  { %v686_v49 = vpop.permute.xlu1 %685 }
 0xc87   :  { %v688_v50 = vadd.f32 %v686_v49, %v678_v48 }
 0xc89   :  { %1253 = vtanh.f32 %v688_v50 }
 0xc96   :  { %v1254_v51 = vpop.eup %1253 }
 0xc97   :  { %691 = vrot.lane.b32.xlu0 %v1254_v51, %s1281_s11 }
 0xd09   :  { %v692_v52 = vpop.permute.xlu0 %691 }
 0xd0a   :  { %v694_v53 = vmul.f32 %v1252_v45, %v692_v52 }
 0xd0c   :  { %698 = vrot.lane.b32.xlu1 %v694_v53, %s1282_s3 }
 0xd7e   :  { %v699_v54 = vpop.permute.xlu1 %698 }
 0xd7f   :  { %1186 = vmatmul.mubr.msk.f32.vlgmr.msra.gmra.mxu1 %vm188_vm3, %v699_v54 }
 0xd80   :  { %1200 = vmatpush3.msra.mxu1 %v1326_v2  ;;  %1207 = vmatprep.mubr.msk.f32.mxu1 %vm1280_vm2, %v1279_v0 }
 0xd81   :  { %1201 = vmatprep.subr.mxu1 %v1279_v0 }
 0xd82   :  { %1202 = vmatpush3.msra.mxu1 %v1340_v5 }
 0xd83   :  { %1203 = vmatprep.subr.mxu1 %v1279_v0 }
 0xd84   :  { %1204 = vmatpush3.msra.mxu1 %v1348_v6 }
 0xd85   :  { %1205 = vmatprep.subr.mxu1 %v1279_v0 }
 0xd86   :  { %1206 = vmatpush3.msra.mxu1 %v1356_v7 }
 0xe3f   :  { %v768_v59 = vpop.f32.mrf.mxu1 }
 0xe40   :  { %v772_v2 = vadd.f32 %v768_v59, %v162_v56 }
 0xe41   :  { %v1187_v60 = vpop.f32.mrf.mxu1 }
 0xe42   :  { %1255 = vtanh.f32 %v772_v2  ;;  %v1052_v62 = vmul.f32 -1.442695, %v772_v2 }
 0xe44   :  { %1257 = vpow2.f32 %v1052_v62 }
 0xe4f   :  { %v1256_v61 = vpop.eup %1255 }
 0xe50   :  { %782 = vrot.lane.b32.xlu0 %v1256_v61, %s1281_s11 }
 0xe51   :  { %v1258_v5 = vpop.eup %1257 }
 0xe52   :  { %v776_v63 = vadd.f32 1.0, %v1258_v5 }
 0xe54   :  { %1259 = vrcp.f32 %v776_v63 }
 0xe61   :  { %v1260_v6 = vpop.eup %1259 }
 0xe62   :  { %v780_v7 = vmul.f32 %v1260_v6, %v688_v50  ;;  %v1058_v50 = vld [vmem:[#allocation3] ss:$0 sm:$0xff] }
 0xec2   :  { %v783_v1 = vpop.permute.xlu0 %782 }
 0xec3   :  { %v785_v0 = vmul.f32 %v1260_v6, %v783_v1 }
 0xec5   :  { %787 = vrot.lane.b32.xlu1 %v785_v0, %s1282_s3 }
 0xf37   :  { %v788_v3 = vpop.permute.xlu1 %787 }
 0xf38   :  { %v790_v55 = vadd.f32 %v788_v3, %v780_v7 }
 0xf3a   :  { %1261 = vtanh.f32 %v790_v55 }
 0xf47   :  { %v1262_v4 = vpop.eup %1261 }
 0xf48   :  { %793 = vrot.lane.b32.xlu0 %v1262_v4, %s1281_s11 }
 0xfba   :  { %v794_v8 = vpop.permute.xlu0 %793 }
 0xfbb   :  { %v796_v10 = vmul.f32 %v1260_v6, %v794_v8 }
 0xfbd   :  { %800 = vrot.lane.b32.xlu1 %v796_v10, %s1282_s3 }
0x102f   :  { %v801_v11 = vpop.permute.xlu1 %800 }
0x1030   :  { %1197 = vmatmul.mubr.msk.f32.vlgmr.msra.gmra.mxu0 %vm188_vm3, %v801_v11 }
0x10f0   :  { %v870_v13 = vpop.f32.mrf.mxu0 }
0x10f1   :  { %v874_v14 = vadd.f32 %v870_v13, %v167_v12 }
0x10f2   :  { %v1198_v15 = vpop.f32.mrf.mxu0 }
0x10f3   :  { %1263 = vtanh.f32 %v874_v14  ;;  %v1054_v17 = vmul.f32 -1.442695, %v874_v14 }
0x10f5   :  { %1265 = vpow2.f32 %v1054_v17 }
0x1100   :  { %v1264_v16 = vpop.eup %1263 }
0x1101   :  { %884 = vrot.lane.b32.xlu0 %v1264_v16, %s1281_s11 }
0x1102   :  { %v1266_v18 = vpop.eup %1265 }
0x1103   :  { %v878_v19 = vadd.f32 1.0, %v1266_v18 }
0x1105   :  { %1267 = vrcp.f32 %v878_v19 }
0x1112   :  { %v1268_v20 = vpop.eup %1267 }
0x1113   :  { %v882_v23 = vmul.f32 %v1268_v20, %v790_v55 }
0x1173   :  { %v885_v21 = vpop.permute.xlu0 %884 }
0x1174   :  { %v887_v22 = vmul.f32 %v1268_v20, %v885_v21 }
0x1176   :  { %889 = vrot.lane.b32.xlu1 %v887_v22, %s1282_s3 }
0x11e8   :  { %v890_v24 = vpop.permute.xlu1 %889 }
0x11e9   :  { %v892_v58 = vadd.f32 %v890_v24, %v882_v23 }
0x11eb   :  { %1269 = vtanh.f32 %v892_v58 }
0x11f8   :  { %v1270_v25 = vpop.eup %1269 }
0x11f9   :  { %895 = vrot.lane.b32.xlu0 %v1270_v25, %s1281_s11 }
0x126b   :  { %v896_v26 = vpop.permute.xlu0 %895 }
0x126c   :  { %v898_v27 = vmul.f32 %v1268_v20, %v896_v26 }
0x126e   :  { %902 = vrot.lane.b32.xlu1 %v898_v27, %s1282_s3 }
0x12e0   :  { %v903_v28 = vpop.permute.xlu1 %902 }
0x12e1   :  { %1208 = vmatmul.mubr.msk.f32.vlgmr.msra.gmra.mxu1 %vm188_vm3, %v903_v28 }
0x13a1   :  { %v972_v30 = vpop.f32.mrf.mxu1 }
0x13a2   :  { %v976_v31 = vadd.f32 %v972_v30, %v172_v29 }
0x13a3   :  { %v1209_v32 = vpop.f32.mrf.mxu1 }
0x13a4   :  { %1271 = vtanh.f32 %v976_v31  ;;  %v1056_v34 = vmul.f32 -1.442695, %v976_v31 }
0x13a6   :  { %1273 = vpow2.f32 %v1056_v34 }
0x13b1   :  { %v1272_v33 = vpop.eup %1271 }
0x13b2   :  { %986 = vrot.lane.b32.xlu0 %v1272_v33, %s1281_s11 }
0x13b3   :  { %v1274_v35 = vpop.eup %1273 }
0x13b4   :  { %v980_v36 = vadd.f32 1.0, %v1274_v35 }
0x13b6   :  { %1275 = vrcp.f32 %v980_v36 }
0x13c3   :  { %v1276_v37 = vpop.eup %1275 }
0x13c4   :  { %v984_v57 = vmul.f32 %v1276_v37, %v892_v58 }
0x1424   :  { %v987_v38 = vpop.permute.xlu0 %986 }
0x1425   :  { %v989_v39 = vmul.f32 %v1276_v37, %v987_v38 }
0x1427   :  { %991 = vrot.lane.b32.xlu1 %v989_v39, %s1282_s3 }
0x142b   :  { %1007 = vrot.lane.b32.xlu1 %v1057_v9, %s1283_s25 }
0x1499   :  { %v992_v40 = vpop.permute.xlu1 %991 }
0x149a   :  { %v994_v41 = vadd.f32 %v992_v40, %v984_v57 }
0x149c   :  { %1277 = vtanh.f32 %v994_v41 }
0x149d   :  { %v1008_v45 = vpop.permute.xlu1 %1007 }
0x14a9   :  { %v1278_v42 = vpop.eup %1277 }
0x14aa   :  { %997 = vrot.lane.b32.xlu0 %v1278_v42, %s1281_s11 }
0x151c   :  { %v998_v44 = vpop.permute.xlu0 %997 }
0x151d   :  { %v1000_v46 = vmul.f32 %v1276_v37, %v998_v44 }
0x151f   :  { %v1010_v47 = vmul.f32 %v1008_v45, %v1000_v46 }
0x1521   :  { %1012 = vrot.lane.b32.xlu0 %v1010_v47, %s1282_s3 }
0x1593   :  { %v1013_v48 = vpop.permute.xlu0 %1012 }
0x1594   :  { %v1015_v49 = vsel %vm188_vm3, %v1013_v48, 0.0 }
0x1595   :  { %1016 = vadd.xlane.f32.xlu1 %v1015_v49 }
0x161e   :  { %v1017_v51 = vpop.xlane.xlu1 %1016 }
0x161f   :  { %v1025_v52 = vadd.f32 %v1058_v50, %v1017_v51 }
0x1621   :  { %1027 = vst.msk [vmem:[%s1535_s6] sm:$0xff] %vm1026_vm4, %v1025_v52 }

</bundles_post_ra>
